<compile_context>
chip_gen: v7x
topology: tpu7x:2x2x1
jax: 0.10.0
libtpu: 0.0.40
codegen_flags: <defaults>
</compile_context>

<pallas_src>
import functools

import jax
import jax.numpy as jnp
from jax.experimental import pallas as pl
from jax.experimental.pallas import tpu as pltpu

Z_DIM = 64
IMG_DIM = 28 * 28 * 1        # 784
HIDDEN = (128, 256, 128)


def _round_up(x, m):
    return (x + m - 1) // m * m


def _leaky_relu(x, slope=0.1):
    return jnp.where(x > 0, x, slope * x)


def _bf16_epilogue_ok():
    """bf16 tanh epilogue only where the VPU/EUP support bf16 (v6e / v7x)."""
    try:
        kind = jax.devices()[0].device_kind.lower()
    except Exception:
        return False
    return ("v6" in kind) or ("v7" in kind)


def generator_kernel(x_ref,
                     w1_ref, b1_ref,
                     w2_ref, b2_ref,
                     w3_ref, b3_ref,
                     w4_ref, b4_ref,
                     o_ref, *, bf16_epilogue):
    # x tile: (TB, Z_DIM) f32 -> bf16 MXU inputs, f32 accumulation.
    x = x_ref[...].astype(jnp.bfloat16)

    h = jnp.dot(x, w1_ref[...], preferred_element_type=jnp.float32) + b1_ref[...]
    h = _leaky_relu(h)

    h = jnp.dot(h.astype(jnp.bfloat16), w2_ref[...],
                preferred_element_type=jnp.float32) + b2_ref[...]
    h = _leaky_relu(h)

    h = jnp.dot(h.astype(jnp.bfloat16), w3_ref[...],
                preferred_element_type=jnp.float32) + b3_ref[...]
    h = _leaky_relu(h)

    h = jnp.dot(h.astype(jnp.bfloat16), w4_ref[...],
                preferred_element_type=jnp.float32) + b4_ref[...]

    if bf16_epilogue:
        # v6e / v7x: halve the EUP tanh element count and the vst vreg count.
        o_ref[...] = jnp.tanh(h.astype(jnp.bfloat16)).astype(o_ref.dtype)
    else:
        # v5e: no bf16 EUP/VPU -> keep tanh in f32, cast only at the store.
        o_ref[...] = jnp.tanh(h).astype(o_ref.dtype)


def prepare_params(params):
    """Cast weights to bf16; biases stay f32 with shape (1, fan_out)."""
    return [(w.astype(jnp.bfloat16), b.astype(jnp.float32)) for (w, b) in params]


def _pick_tile(B, tb_max):
    """Batch tile: multiple of 8, <= tb_max, >= 2 grid steps when possible."""
    b8 = _round_up(B, 8)
    tile = min(tb_max, b8)
    if b8 // tile < 2 and b8 >= 16:
        # v7x has 2 TensorCores on the "parallel" axis: keep at least 2 steps.
        tile = _round_up((b8 + 1) // 2, 8)
    return tile


def generator_forward(x, prepared_params, *, tb=512, bf16_epilogue=None):
    """x: (B, Z_DIM) float32. Returns (B, IMG_DIM) bfloat16."""
    if bf16_epilogue is None:
        bf16_epilogue = _bf16_epilogue_ok()

    B = x.shape[0]
    tile = _pick_tile(B, tb)
    b_pad = _round_up(B, tile)
    if b_pad != B:
        x = jnp.pad(x, ((0, b_pad - B), (0, 0)))

    (w1, b1), (w2, b2), (w3, b3), (w4, b4) = prepared_params
    consts = (w1, b1, w2, b2, w3, b3, w4, b4)

    in_specs = [pl.BlockSpec((tile, Z_DIM), lambda i: (i, 0))]
    in_specs += [pl.BlockSpec(a.shape, lambda i: (0, 0)) for a in consts]
    # Output block last dim equals the full array dim (784) -> legal; only the
    # final 16-lane group takes a masked vst.  Output dtype is bf16.
    out_spec = pl.BlockSpec((tile, IMG_DIM), lambda i: (i, 0))

    # VMEM budget: resident weights (x2 slack), double-buffered in/out tiles,
    # f32 activations (incl. the (tile, 784) pre-tanh) + bf16 cast temporaries
    # (x2 slack), plus headroom.  Capped at 48 MiB (safe on v7x's 64 MiB).
    w_bytes = sum(a.size * a.dtype.itemsize for a in consts)
    io_bytes = 2 * (tile * Z_DIM * 4) + 2 * (tile * IMG_DIM * 2)
    act_bytes = tile * (128 + 256 + 128 + 2 * IMG_DIM) * 4      # f32 activations
    act_bytes += tile * (Z_DIM + 128 + 256 + 128 + IMG_DIM) * 2  # bf16 temporaries
    vmem_limit = min(int(2 * w_bytes + io_bytes + 2 * act_bytes + (8 << 20)),
                     48 << 20)

    kernel = functools.partial(generator_kernel, bf16_epilogue=bf16_epilogue)

    out = pl.pallas_call(
        kernel,
        out_shape=jax.ShapeDtypeStruct((b_pad, IMG_DIM), jnp.bfloat16),
        grid_spec=pltpu.PrefetchScalarGridSpec(
            num_scalar_prefetch=0,
            grid=(b_pad // tile,),
            in_specs=in_specs,
            out_specs=out_spec,
        ),
        compiler_params=pltpu.CompilerParams(
            dimension_semantics=("parallel",),
            vmem_limit_bytes=vmem_limit,
        ),
    )(x, *consts)
    return out if b_pad == B else out[:B]


def init_params(key):
    """Deterministic init mimicking PyTorch nn.Linear (uniform +-1/sqrt(fan_in))."""
    dims = (Z_DIM,) + HIDDEN + (IMG_DIM,)
    params = []
    for i in range(len(dims) - 1):
        fan_in, fan_out = dims[i], dims[i + 1]
        key, kw, kb = jax.random.split(key, 3)
        bound = 1.0 / (fan_in ** 0.5)
        w = jax.random.uniform(kw, (fan_in, fan_out), jnp.float32, -bound, bound)
        b = jax.random.uniform(kb, (1, fan_out), jnp.float32, -bound, bound)
        params.append((w, b))
    return params


def reference_forward(x, prepared_params, *, bf16_epilogue):
    """Pure-JAX reference mirroring the kernel's dtype path."""
    h = x
    n = len(prepared_params)
    for i, (w, b) in enumerate(prepared_params):
        h = jnp.dot(h.astype(jnp.bfloat16), w,
                    preferred_element_type=jnp.float32) + b
        if i < n - 1:
            h = jnp.where(h > 0, h, 0.1 * h)
        elif bf16_epilogue:
            h = jnp.tanh(h.astype(jnp.bfloat16))
        else:
            h = jnp.tanh(h)
    return h.astype(jnp.bfloat16)


if __name__ == "__main__":
    key = jax.random.PRNGKey(0)
    k_params, k_x1, k_x2 = jax.random.split(key, 3)

    params = init_params(k_params)
    prepared = prepare_params(params)
    use_bf16_epi = _bf16_epilogue_ok()

    # Small batch (matches the module's typical latent batch).
    B_small = 8
    x_small = jax.random.normal(k_x1, (B_small, Z_DIM), jnp.float32)
    out_small = jax.block_until_ready(
        generator_forward(x_small, prepared, bf16_epilogue=use_bf16_epi))
    ref_small = reference_forward(x_small, prepared, bf16_epilogue=use_bf16_epi)
    assert out_small.shape == (B_small, IMG_DIM), out_small.shape
    assert out_small.dtype == jnp.bfloat16, out_small.dtype
    assert jnp.allclose(out_small.astype(jnp.float32),
                        ref_small.astype(jnp.float32),
                        atol=1.5e-2, rtol=1.5e-2), "mismatch (B=8)"

    # Larger batch exercises the batch grid (2 tiles of 256) with no padding
    # and no wrapper-side slices.
    B_big = 512
    x_big = jax.random.normal(k_x2, (B_big, Z_DIM), jnp.float32)
    out_big = jax.block_until_ready(
        generator_forward(x_big, prepared, tb=512, bf16_epilogue=use_bf16_epi))
    ref_big = reference_forward(x_big, prepared, bf16_epilogue=use_bf16_epi)
    assert out_big.shape == (B_big, IMG_DIM), out_big.shape
    assert jnp.allclose(out_big.astype(jnp.float32),
                        ref_big.astype(jnp.float32),
                        atol=1.5e-2, rtol=1.5e-2), "mismatch (B=512)"

    print("KERNEL_OK")
</pallas_src>

<mosaic_0001>
module attributes {stable_mosaic.version = 11 : i64} {
  func.func @generator_kernel(%arg0: i32, %arg1: memref<8x64xf32, #tpu.memory_space<vmem>>, %arg2: memref<64x128xbf16, #tpu.memory_space<vmem>>, %arg3: memref<1x128xf32, #tpu.memory_space<vmem>>, %arg4: memref<128x256xbf16, #tpu.memory_space<vmem>>, %arg5: memref<1x256xf32, #tpu.memory_space<vmem>>, %arg6: memref<256x128xbf16, #tpu.memory_space<vmem>>, %arg7: memref<1x128xf32, #tpu.memory_space<vmem>>, %arg8: memref<128x784xbf16, #tpu.memory_space<vmem>>, %arg9: memref<1x784xf32, #tpu.memory_space<vmem>>, %arg10: memref<8x784xbf16, #tpu.memory_space<vmem>>) attributes {dimension_semantics = [#tpu.dimension_semantics<parallel>], iteration_bounds = array<i64: 1>, scalar_prefetch = 0 : i64, scratch_operands = 0 : i64, tpu.core_type = #tpu.core_type<tc>, window_params = [{transform_indices = @transform_0, window_bounds = array<i64: 8, 64>}, {pipeline_mode = #tpu.pipeline_mode<synchronous>, transform_indices = @transform_1, window_bounds = array<i64: 64, 128>}, {pipeline_mode = #tpu.pipeline_mode<synchronous>, transform_indices = @transform_2, window_bounds = array<i64: 1, 128>}, {pipeline_mode = #tpu.pipeline_mode<synchronous>, transform_indices = @transform_3, window_bounds = array<i64: 128, 256>}, {pipeline_mode = #tpu.pipeline_mode<synchronous>, transform_indices = @transform_4, window_bounds = array<i64: 1, 256>}, {pipeline_mode = #tpu.pipeline_mode<synchronous>, transform_indices = @transform_5, window_bounds = array<i64: 256, 128>}, {pipeline_mode = #tpu.pipeline_mode<synchronous>, transform_indices = @transform_6, window_bounds = array<i64: 1, 128>}, {pipeline_mode = #tpu.pipeline_mode<synchronous>, transform_indices = @transform_7, window_bounds = array<i64: 128, 784>}, {pipeline_mode = #tpu.pipeline_mode<synchronous>, transform_indices = @transform_8, window_bounds = array<i64: 1, 784>}, {transform_indices = @transform_9, window_bounds = array<i64: 8, 784>}]} {
    %c0 = arith.constant 0 : index
    %c0_0 = arith.constant 0 : index
    %0 = vector.load %arg1[%c0, %c0_0] : memref<8x64xf32, #tpu.memory_space<vmem>>, vector<8x64xf32>
    %1 = arith.truncf %0 : vector<8x64xf32> to vector<8x64xbf16>
    %c0_1 = arith.constant 0 : index
    %c0_2 = arith.constant 0 : index
    %2 = vector.load %arg2[%c0_1, %c0_2] : memref<64x128xbf16, #tpu.memory_space<vmem>>, vector<64x128xbf16>
    %cst = arith.constant dense<0.000000e+00> : vector<8x128xf32>
    %3 = tpu.matmul %1, %2, %cst {dimension_numbers = #tpu.dot_dimension_numbers<[1], [0], [0], [1], [0, 0, 1, 1], [], []>} : vector<8x64xbf16>, vector<64x128xbf16>, vector<8x128xf32> -> vector<8x128xf32>
    %c0_3 = arith.constant 0 : index
    %c0_4 = arith.constant 0 : index
    %4 = vector.load %arg3[%c0_3, %c0_4] : memref<1x128xf32, #tpu.memory_space<vmem>>, vector<1x128xf32>
    %5 = vector.broadcast %4 : vector<1x128xf32> to vector<8x128xf32>
    %6 = arith.addf %3, %5 : vector<8x128xf32>
    %cst_5 = arith.constant 0.000000e+00 : f32
    %7 = vector.broadcast %cst_5 : f32 to vector<8x128xf32>
    %8 = arith.cmpf ogt, %6, %7 : vector<8x128xf32>
    %cst_6 = arith.constant 1.000000e-01 : f32
    %9 = vector.broadcast %cst_6 : f32 to vector<8x128xf32>
    %10 = arith.mulf %9, %6 : vector<8x128xf32>
    %11 = arith.select %8, %6, %10 : vector<8x128xi1>, vector<8x128xf32>
    %12 = arith.truncf %11 : vector<8x128xf32> to vector<8x128xbf16>
    %c0_7 = arith.constant 0 : index
    %c0_8 = arith.constant 0 : index
    %13 = vector.load %arg4[%c0_7, %c0_8] : memref<128x256xbf16, #tpu.memory_space<vmem>>, vector<128x256xbf16>
    %cst_9 = arith.constant dense<0.000000e+00> : vector<8x256xf32>
    %14 = tpu.matmul %12, %13, %cst_9 {dimension_numbers = #tpu.dot_dimension_numbers<[1], [0], [0], [1], [0, 0, 1, 1], [], []>} : vector<8x128xbf16>, vector<128x256xbf16>, vector<8x256xf32> -> vector<8x256xf32>
    %c0_10 = arith.constant 0 : index
    %c0_11 = arith.constant 0 : index
    %15 = vector.load %arg5[%c0_10, %c0_11] : memref<1x256xf32, #tpu.memory_space<vmem>>, vector<1x256xf32>
    %16 = vector.broadcast %15 : vector<1x256xf32> to vector<8x256xf32>
    %17 = arith.addf %14, %16 : vector<8x256xf32>
    %cst_12 = arith.constant 0.000000e+00 : f32
    %18 = vector.broadcast %cst_12 : f32 to vector<8x256xf32>
    %19 = arith.cmpf ogt, %17, %18 : vector<8x256xf32>
    %cst_13 = arith.constant 1.000000e-01 : f32
    %20 = vector.broadcast %cst_13 : f32 to vector<8x256xf32>
    %21 = arith.mulf %20, %17 : vector<8x256xf32>
    %22 = arith.select %19, %17, %21 : vector<8x256xi1>, vector<8x256xf32>
    %23 = arith.truncf %22 : vector<8x256xf32> to vector<8x256xbf16>
    %c0_14 = arith.constant 0 : index
    %c0_15 = arith.constant 0 : index
    %24 = vector.load %arg6[%c0_14, %c0_15] : memref<256x128xbf16, #tpu.memory_space<vmem>>, vector<256x128xbf16>
    %cst_16 = arith.constant dense<0.000000e+00> : vector<8x128xf32>
    %25 = tpu.matmul %23, %24, %cst_16 {dimension_numbers = #tpu.dot_dimension_numbers<[1], [0], [0], [1], [0, 0, 1, 1], [], []>} : vector<8x256xbf16>, vector<256x128xbf16>, vector<8x128xf32> -> vector<8x128xf32>
    %c0_17 = arith.constant 0 : index
    %c0_18 = arith.constant 0 : index
    %26 = vector.load %arg7[%c0_17, %c0_18] : memref<1x128xf32, #tpu.memory_space<vmem>>, vector<1x128xf32>
    %27 = vector.broadcast %26 : vector<1x128xf32> to vector<8x128xf32>
    %28 = arith.addf %25, %27 : vector<8x128xf32>
    %cst_19 = arith.constant 0.000000e+00 : f32
    %29 = vector.broadcast %cst_19 : f32 to vector<8x128xf32>
    %30 = arith.cmpf ogt, %28, %29 : vector<8x128xf32>
    %cst_20 = arith.constant 1.000000e-01 : f32
    %31 = vector.broadcast %cst_20 : f32 to vector<8x128xf32>
    %32 = arith.mulf %31, %28 : vector<8x128xf32>
    %33 = arith.select %30, %28, %32 : vector<8x128xi1>, vector<8x128xf32>
    %34 = arith.truncf %33 : vector<8x128xf32> to vector<8x128xbf16>
    %c0_21 = arith.constant 0 : index
    %c0_22 = arith.constant 0 : index
    %35 = vector.load %arg8[%c0_21, %c0_22] : memref<128x784xbf16, #tpu.memory_space<vmem>>, vector<128x784xbf16>
    %cst_23 = arith.constant dense<0.000000e+00> : vector<8x784xf32>
    %36 = tpu.matmul %34, %35, %cst_23 {dimension_numbers = #tpu.dot_dimension_numbers<[1], [0], [0], [1], [0, 0, 1, 1], [], []>} : vector<8x128xbf16>, vector<128x784xbf16>, vector<8x784xf32> -> vector<8x784xf32>
    %c0_24 = arith.constant 0 : index
    %c0_25 = arith.constant 0 : index
    %37 = vector.load %arg9[%c0_24, %c0_25] : memref<1x784xf32, #tpu.memory_space<vmem>>, vector<1x784xf32>
    %38 = vector.broadcast %37 : vector<1x784xf32> to vector<8x784xf32>
    %39 = arith.addf %36, %38 : vector<8x784xf32>
    %40 = math.tanh %39 : vector<8x784xf32>
    %41 = arith.truncf %40 : vector<8x784xf32> to vector<8x784xbf16>
    %c0_26 = arith.constant 0 : index
    %c0_27 = arith.constant 0 : index
    %42 = vector.load %arg10[%c0_26, %c0_27] : memref<8x784xbf16, #tpu.memory_space<vmem>>, vector<8x784xbf16>
    tpu.vector_store %arg10[%c0_26, %c0_27], %41 {strides = array<i32>} : memref<8x784xbf16, #tpu.memory_space<vmem>>, vector<8x784xbf16>,
    return
  }
  func.func @transform_0(%arg0: i32) -> (i32, i32) {
    %c0_i32 = arith.constant 0 : i32
    %c0_i32_0 = arith.constant 0 : i32
    return %arg0, %c0_i32 : i32, i32
  }
  func.func @transform_1(%arg0: i32) -> (i32, i32) {
    %c0_i32 = arith.constant 0 : i32
    %c0_i32_0 = arith.constant 0 : i32
    %c0_i32_1 = arith.constant 0 : i32
    return %c0_i32, %c0_i32_0 : i32, i32
  }
  func.func @transform_2(%arg0: i32) -> (i32, i32) {
    %c0_i32 = arith.constant 0 : i32
    %c0_i32_0 = arith.constant 0 : i32
    %c0_i32_1 = arith.constant 0 : i32
    return %c0_i32, %c0_i32_0 : i32, i32
  }
  func.func @transform_3(%arg0: i32) -> (i32, i32) {
    %c0_i32 = arith.constant 0 : i32
    %c0_i32_0 = arith.constant 0 : i32
    %c0_i32_1 = arith.constant 0 : i32
    return %c0_i32, %c0_i32_0 : i32, i32
  }
  func.func @transform_4(%arg0: i32) -> (i32, i32) {
    %c0_i32 = arith.constant 0 : i32
    %c0_i32_0 = arith.constant 0 : i32
    %c0_i32_1 = arith.constant 0 : i32
    return %c0_i32, %c0_i32_0 : i32, i32
  }
  func.func @transform_5(%arg0: i32) -> (i32, i32) {
    %c0_i32 = arith.constant 0 : i32
    %c0_i32_0 = arith.constant 0 : i32
    %c0_i32_1 = arith.constant 0 : i32
    return %c0_i32, %c0_i32_0 : i32, i32
  }
  func.func @transform_6(%arg0: i32) -> (i32, i32) {
    %c0_i32 = arith.constant 0 : i32
    %c0_i32_0 = arith.constant 0 : i32
    %c0_i32_1 = arith.constant 0 : i32
    return %c0_i32, %c0_i32_0 : i32, i32
  }
  func.func @transform_7(%arg0: i32) -> (i32, i32) {
    %c0_i32 = arith.constant 0 : i32
    %c0_i32_0 = arith.constant 0 : i32
    %c0_i32_1 = arith.constant 0 : i32
    return %c0_i32, %c0_i32_0 : i32, i32
  }
  func.func @transform_8(%arg0: i32) -> (i32, i32) {
    %c0_i32 = arith.constant 0 : i32
    %c0_i32_0 = arith.constant 0 : i32
    %c0_i32_1 = arith.constant 0 : i32
    return %c0_i32, %c0_i32_0 : i32, i32
  }
  func.func @transform_9(%arg0: i32) -> (i32, i32) {
    %c0_i32 = arith.constant 0 : i32
    %c0_i32_0 = arith.constant 0 : i32
    return %arg0, %c0_i32 : i32, i32
  }
}

</mosaic_0001>

<bundles_post_ra>
// kernel: tpu_custom_call.1
= control target key start
LH: loop header
LB: loop body
LE: loop exit
PB: predicated region body
PF: predicated region fallthrough
CT: control target
= control target key end

     0   :  { %v1403_v1 = vmov 0.0   ;;  %vm1404_vm0 = vmmov 0   ;;  %vm75_vm1 = vcmask 523264   ;;  %s1797_s0 = inlined_call_operand.vmem [shape: f32[8,64], index: 0, kind: input, shape index: {}]   ;;  %s1798_s1 = inlined_call_operand.vmem [shape: bf16[64,128], index: 1, kind: input, shape index: {}]   ;;  %s1799_s2 = inlined_call_operand.vmem [shape: f32[1,128], index: 2, kind: input, shape index: {}]   ;;  %s1800_s3 = inlined_call_operand.vmem [shape: bf16[128,256], index: 3, kind: input, shape index: {}]   ;;  %s1801_s4 = inlined_call_operand.vmem [shape: f32[1,256], index: 4, kind: input, shape index: {}]   ;;  %s1802_s5 = inlined_call_operand.vmem [shape: bf16[256,128], index: 5, kind: input, shape index: {}]   ;;  %s1803_s6 = inlined_call_operand.vmem [shape: f32[1,128], index: 6, kind: input, shape index: {}]   ;;  %s1804_s7 = inlined_call_operand.vmem [shape: bf16[128,784], index: 7, kind: input, shape index: {}]   ;;  %s1805_s8 = inlined_call_operand.vmem [shape: f32[1,784], index: 8, kind: input, shape index: {}]   ;;  %s1806_s9 = inlined_call_operand.hbm [shape: bf16[8,784], index: 9, kind: output, shape index: {}]  }
   0x1   :  { %v1241_v0 = vld [vmem:[%s1798_s1] sm:$0xff]   ;;  %1205 = vmatprep.subr.bf16.mxu0 %v1403_v1  ;;  %v1242_v2 = vld [vmem:[%s1798_s1 + $0x8] sm:$0xff]   ;;  %1213 = vmatprep.mubr.msk.bf16.mxu0 %vm1404_vm0, %v1403_v1  ;;  %v1243_v5 = vld [vmem:[%s1798_s1 + $0x10] sm:$0xff]  }
   0x2   :  { %1206 = vmatpush3.bf16.msra.mxu0 %v1241_v0  ;;  %v1245_v3 = vld [vmem:[%s1800_s3 + $0x4] ss:$8 sps:$4 sm:$0xff]   ;;  %v1247_v4 = vld [vmem:[%s1800_s3] ss:$8 sps:$4 sm:$0xff]   ;;  %v1248_v6 = vld [vmem:[%s1800_s3 + $0x14] ss:$8 sps:$4 sm:$0xff]  }
   0x3   :  { %1207 = vmatprep.subr.bf16.mxu0 %v1403_v1  ;;  %231 = vmatprep.subr.bf16.mxu1 %v1245_v3  ;;  %v1250_v7 = vld [vmem:[%s1800_s3 + $0x10] ss:$8 sps:$4 sm:$0xff]   ;;  %v1251_v8 = vld [vmem:[%s1800_s3 + $0x24] ss:$8 sps:$4 sm:$0xff]   ;;  %v1253_v11 = vld [vmem:[%s1800_s3 + $0x20] ss:$8 sps:$4 sm:$0xff]  }
   0x4   :  { %232 = vmatpush1.bf16.msra.mxu1 %v1247_v4  ;;  %v1244_v9 = vld [vmem:[%s1798_s1 + $0x18] sm:$0xff]   ;;  %v34_v10 = vld [vmem:[%s1797_s0] sm:$0xff] }
   0x5   :  { %233 = vmatprep.subr.bf16.mxu1 %v1248_v6  ;;  %v1254_v12 = vld [vmem:[%s1800_s3 + $0x34] ss:$8 sps:$4 sm:$0xff]   ;;  %v35_v13 = vpack.c.bf16 %v34_v10, %v34_v10  ;;  %v1256_v14 = vld [vmem:[%s1800_s3 + $0x30] ss:$8 sps:$4 sm:$0xff]   ;;  %v1257_v15 = vld [vmem:[%s1800_s3 + $0x44] ss:$8 sps:$4 sm:$0xff]  }
   0x6   :  { %1208 = vmatpush3.bf16.msra.mxu0 %v1242_v2  ;;  %v1259_v16 = vld [vmem:[%s1800_s3 + $0x40] ss:$8 sps:$4 sm:$0xff]   ;;  %v1260_v17 = vld [vmem:[%s1800_s3 + $0x54] ss:$8 sps:$4 sm:$0xff]   ;;  %v1262_v18 = vld [vmem:[%s1800_s3 + $0x50] ss:$8 sps:$4 sm:$0xff]  }
   0x7   :  { %1209 = vmatprep.subr.bf16.mxu0 %v1403_v1 }
   0x8   :  { %234 = vmatpush1.bf16.msra.mxu1 %v1250_v7 }
   0x9   :  { %235 = vmatprep.subr.bf16.mxu1 %v1251_v8 }
   0xa   :  { %1210 = vmatpush3.bf16.msra.mxu0 %v1243_v5 }
   0xb   :  { %1211 = vmatprep.subr.bf16.mxu0 %v1403_v1 }
   0xc   :  { %236 = vmatpush1.bf16.msra.mxu1 %v1253_v11 }
   0xd   :  { %237 = vmatprep.subr.bf16.mxu1 %v1254_v12 }
   0xe   :  { %1212 = vmatpush3.bf16.msra.mxu0 %v1244_v9 }
  0x10   :  { %238 = vmatpush1.bf16.msra.mxu1 %v1256_v14 }
  0x11   :  { %1214 = vmatmul.mubr.msk.bf16.vlgmr.msra.gmra.mrb[0].mxu0 %vm75_vm1, %v35_v13  ;;  %239 = vmatprep.subr.bf16.mxu1 %v1257_v15 }
  0x14   :  { %240 = vmatpush1.bf16.msra.mxu1 %v1259_v16 }
  0x15   :  { %241 = vmatprep.subr.bf16.mxu1 %v1260_v17 }
  0x18   :  { %242 = vmatpush1.bf16.msra.mxu1 %v1262_v18 }
  0x19   :  { %14 = vsyncpa [#allocation3], 0  ;;  %v1263_v19 = vld [vmem:[%s1800_s3 + $0x64] ss:$8 sps:$4 sm:$0xff]   ;;  %v1265_v20 = vld [vmem:[%s1800_s3 + $0x60] ss:$8 sps:$4 sm:$0xff]   ;;  %v141_v62 = vlaneseq }
  0x1a   :  { %243 = vmatprep.subr.bf16.mxu1 %v1263_v19  ;;  %v1266_v21 = vld [vmem:[%s1800_s3 + $0x74] ss:$8 sps:$4 sm:$0xff]   ;;  %v1268_v22 = vld [vmem:[%s1800_s3 + $0x70] ss:$8 sps:$4 sm:$0xff]   ;;  %v1405_v23 = vmov 0   ;;  %v1269_v24 = vld [vmem:[%s1802_s5 + $0x40] sm:$0xff]  }
  0x1b   :  { %263 = vmatprep.mubr.bf16.mxu1 %v1405_v23  ;;  %v1270_v25 = vld [vmem:[%s1802_s5] sm:$0xff]   ;;  %v1271_v26 = vld [vmem:[%s1802_s5 + $0x48] sm:$0xff]   ;;  %1174 = vmatprep.subr.bf16.mxu0 %v1269_v24  ;;  %v1273_v28 = vld [vmem:[%s1802_s5 + $0x50] sm:$0xff]   ;;  %v1618_v63 = vshrl.u32 %v141_v62, 7  ;;  %vm1050_vm6 = vcmask 125952  }
  0x1c   :  { %244 = vmatpush1.bf16.msra.mxu1 %v1265_v20  ;;  %1175 = vmatpush3.bf16.msra.mxu0 %v1270_v25  ;;  %v1272_v27 = vld [vmem:[%s1802_s5 + $0x8] sm:$0xff]   ;;  %v1274_v29 = vld [vmem:[%s1802_s5 + $0x10] sm:$0xff]   ;;  %v1275_v30 = vld [vmem:[%s1802_s5 + $0x58] sm:$0xff]  }
  0x1d   :  { %245 = vmatprep.subr.bf16.mxu1 %v1266_v21  ;;  %1176 = vmatprep.subr.bf16.mxu0 %v1271_v26  ;;  %v1276_v31 = vld [vmem:[%s1802_s5 + $0x18] sm:$0xff]   ;;  %v1277_v32 = vld [vmem:[%s1802_s5 + $0x60] sm:$0xff]   ;;  %v1279_v34 = vld [vmem:[%s1802_s5 + $0x68] sm:$0xff]   ;;  %v143_v0 = vsub.s32 0, %v1618_v63  ;;  %v147_v3 = vsub.s32 1, %v1618_v63 }
  0x1e   :  { %v1278_v33 = vld [vmem:[%s1802_s5 + $0x20] sm:$0xff]   ;;  %v1280_v35 = vld [vmem:[%s1802_s5 + $0x28] sm:$0xff]   ;;  %v1281_v45 = vld [vmem:[%s1802_s5 + $0x70] sm:$0xff]  }
  0x1f   :  { %v1066_v36 = vld [vmem:[%s1799_s2] ss:$0 sm:$0xff]  ;;  %v1282_v46 = vld [vmem:[%s1802_s5 + $0x30] sm:$0xff]   ;;  %v1283_v47 = vld [vmem:[%s1802_s5 + $0x78] sm:$0xff]  }
  0x20   :  { %246 = vmatpush1.bf16.msra.mxu1 %v1268_v22  ;;  %1177 = vmatpush3.bf16.msra.mxu0 %v1272_v27  ;;  %v1284_v48 = vld [vmem:[%s1802_s5 + $0x38] sm:$0xff]   ;;  %v1287_v50 = vld [vmem:[%s1804_s7 + $0x4] ss:$28 sps:$4 sm:$0xff]   ;;  %v1290_v51 = vld [vmem:[%s1804_s7 + $0xc] ss:$28 sps:$4 sm:$0xff]  }
  0x21   :  { %1178 = vmatprep.subr.bf16.mxu0 %v1273_v28  ;;  %v1285_v49 = vld [vmem:[%s1804_s7] ss:$28 sps:$4 sm:$0xff]   ;;  %848 = vmatprep.subr.bf16.mxu1 %v1287_v50  ;;  %v1291_v53 = vld [vmem:[%s1804_s7 + $0x38] ss:$28 sps:$4 sm:$0xff]   ;;  %v1297_v55 = vld [vmem:[%s1804_s7 + $0x70] ss:$28 sps:$4 sm:$0xff]  }
  0x22   :  { %v1293_v52 = vld [vmem:[%s1804_s7 + $0x3c] ss:$28 sps:$4 sm:$0xff]   ;;  %v1299_v54 = vld [vmem:[%s1804_s7 + $0x74] ss:$28 sps:$4 sm:$0xff]   ;;  %v1305_v56 = vld [vmem:[%s1804_s7 + $0xac] ss:$28 sps:$4 sm:$0xff]  }
  0x23   :  { %v1303_v57 = vld [vmem:[%s1804_s7 + $0xa8] ss:$28 sps:$4 sm:$0xff]   ;;  %v1309_v59 = vld [vmem:[%s1804_s7 + $0xe0] ss:$28 sps:$4 sm:$0xff]   ;;  %v1315_v61 = vld [vmem:[%s1804_s7 + $0x118] ss:$28 sps:$4 sm:$0xff]  }
  0x24   :  { %1179 = vmatpush3.bf16.msra.mxu0 %v1274_v29  ;;  %v1311_v58 = vld [vmem:[%s1804_s7 + $0xe4] ss:$28 sps:$4 sm:$0xff]   ;;  %v1317_v60 = vld [vmem:[%s1804_s7 + $0x11c] ss:$28 sps:$4 sm:$0xff]   ;;  %v1308_v24 = vld [vmem:[%s1804_s7 + $0xb4] ss:$28 sps:$4 sm:$0xff]  }
  0x25   :  { %1180 = vmatprep.subr.bf16.mxu0 %v1275_v30  ;;  %v139_v2 = vld [vmem:[%s1801_s4] sm:$0x3]  ;;  %v1288_v17 = vld [vmem:[%s1804_s7 + $0x8] ss:$28 sps:$4 sm:$0xff]   ;;  %v1302_v21 = vld [vmem:[%s1804_s7 + $0x7c] ss:$28 sps:$4 sm:$0xff]  }
  0x26   :  { %v144_v4 = vrot.slane %v139_v2, %v143_v0  ;;  %v148_v5 = vrot.slane %v139_v2, %v147_v3  ;;  %v1296_v19 = vld [vmem:[%s1804_s7 + $0x44] ss:$28 sps:$4 sm:$0xff]   ;;  %v1300_v22 = vld [vmem:[%s1804_s7 + $0x78] ss:$28 sps:$4 sm:$0xff]   ;;  %v1306_v25 = vld [vmem:[%s1804_s7 + $0xb0] ss:$28 sps:$4 sm:$0xff]  }
  0x27   :  { %v1294_v20 = vld [vmem:[%s1804_s7 + $0x40] ss:$28 sps:$4 sm:$0xff]   ;;  %v1314_v26 = vld [vmem:[%s1804_s7 + $0xec] ss:$28 sps:$4 sm:$0xff]   ;;  %v1323_v30 = vld [vmem:[%s1804_s7 + $0x154] ss:$28 sps:$4 sm:$0xff]  }
  0x28   :  { %1181 = vmatpush3.bf16.msra.mxu0 %v1276_v31  ;;  %v1312_v27 = vld [vmem:[%s1804_s7 + $0xe8] ss:$28 sps:$4 sm:$0xff]   ;;  %v1318_v29 = vld [vmem:[%s1804_s7 + $0x120] ss:$28 sps:$4 sm:$0xff]  }
  0x29   :  { %1182 = vmatprep.subr.bf16.mxu0 %v1277_v32  ;;  %v1320_v28 = vld [vmem:[%s1804_s7 + $0x124] ss:$28 sps:$4 sm:$0xff]   ;;  %v1326_v31 = vld [vmem:[%s1804_s7 + $0x15c] ss:$28 sps:$4 sm:$0xff]   ;;  %v1321_v32 = vld [vmem:[%s1804_s7 + $0x150] ss:$28 sps:$4 sm:$0xff]  }
  0x2a   :  { %v1355_v62 = vld [vmem:[%s1804_s7 + $0x12c] ss:$28 sps:$4 sm:$0xff]  }
  0x2b   :  { %v1353_v2 = vld [vmem:[%s1804_s7 + $0x128] ss:$28 sps:$4 sm:$0xff]  }
  0x2c   :  { %1183 = vmatpush3.bf16.msra.mxu0 %v1278_v33  ;;  %v1324_v33 = vld [vmem:[%s1804_s7 + $0x158] ss:$28 sps:$4 sm:$0xff]  }
  0x2d   :  { %1184 = vmatprep.subr.bf16.mxu0 %v1279_v34  ;;  %v1329_v34 = vld [vmem:[%s1804_s7 + $0x18c] ss:$28 sps:$4 sm:$0xff]  }
  0x30   :  { %1185 = vmatpush3.bf16.msra.mxu0 %v1280_v35  ;;  %v1332_v35 = vld [vmem:[%s1804_s7 + $0x194] ss:$28 sps:$4 sm:$0xff]  }
  0x31   :  { %1186 = vmatprep.subr.bf16.mxu0 %v1281_v45 }
  0x34   :  { %1187 = vmatpush3.bf16.msra.mxu0 %v1282_v46 }
  0x35   :  { %1188 = vmatprep.subr.bf16.mxu0 %v1283_v47 }
  0x38   :  { %1189 = vmatpush3.bf16.msra.mxu0 %v1284_v48  ;;  %v1333_v48 = vld [vmem:[%s1804_s7 + $0x10] ss:$28 sps:$4 sm:$0xff]  }
  0x39   :  { %889 = vmatprep.subr.bf16.mxu0 %v1290_v51  ;;  %v1339_v51 = vld [vmem:[%s1804_s7 + $0x4c] ss:$28 sps:$4 sm:$0xff]  }
  0xe4   :  { %v113_v37 = vpop.f32.mrb[0].mxu0 }
  0xe5   :  { %v114_v38 = vadd.f32 %v1066_v36, %v113_v37  ;;  %v1215_v39 = vpop.f32.mrb[1].mxu0  ;;  %v1327_v36 = vld [vmem:[%s1804_s7 + $0x188] ss:$28 sps:$4 sm:$0xff]   ;;  %v1330_v37 = vld [vmem:[%s1804_s7 + $0x190] ss:$28 sps:$4 sm:$0xff]  }
  0xe6   :  { %v116_v40 = vpop.f32.mrb[2].mxu0 }
  0xe7   :  { %vm119_vm2 = vcmp.gt.f32.partialorder %v114_v38, 0.0  ;;  %v120_v41 = vmul.f32 0.1, %v114_v38  ;;  %v1216_v42 = vpop.f32.mrb[3].mxu0  ;;  %v1088_v40 = vld [vmem:[%s1803_s6] ss:$0 sm:$0xff] }
  0xe9   :  { %v121_v43 = vsel %vm119_vm2, %v114_v38, %v120_v41  ;;  %v1335_v38 = vld [vmem:[%s1804_s7 + $0x14] ss:$28 sps:$4 sm:$0xff]  }
  0xea   :  { %v122_v44 = vpack.c.bf16 %v121_v43, %v121_v43 }
  0xec   :  { %264 = vmatmul.mubr.bf16.vlgmr.msra.gmra.mrb[0].mxu1 %v122_v44 }
  0xed   :  { %880 = vmatprep.mubr.bf16.mxu1 %v1405_v23  ;;  %849 = vmatpush1.bf16.msra.mxu1 %v1285_v49  ;;  %v1336_v49 = vld [vmem:[%s1804_s7 + $0x18] ss:$28 sps:$4 sm:$0xff]  }
  0xee   :  { %850 = vmatprep.subr.bf16.mxu1 %v1293_v52  ;;  %v1337_v52 = vld [vmem:[%s1804_s7 + $0x48] ss:$28 sps:$4 sm:$0xff]  }
  0xf1   :  { %851 = vmatpush1.bf16.msra.mxu1 %v1291_v53  ;;  %v1340_v53 = vld [vmem:[%s1804_s7 + $0x50] ss:$28 sps:$4 sm:$0xff]  }
  0xf2   :  { %852 = vmatprep.subr.bf16.mxu1 %v1299_v54  ;;  %v1343_v54 = vld [vmem:[%s1804_s7 + $0x84] ss:$28 sps:$4 sm:$0xff]  }
  0xf5   :  { %853 = vmatpush1.bf16.msra.mxu1 %v1297_v55  ;;  %v1341_v55 = vld [vmem:[%s1804_s7 + $0x80] ss:$28 sps:$4 sm:$0xff]  }
  0xf6   :  { %854 = vmatprep.subr.bf16.mxu1 %v1305_v56  ;;  %v1344_v56 = vld [vmem:[%s1804_s7 + $0x88] ss:$28 sps:$4 sm:$0xff]  }
  0xf9   :  { %855 = vmatpush1.bf16.msra.mxu1 %v1303_v57  ;;  %v1345_v57 = vld [vmem:[%s1804_s7 + $0xb8] ss:$28 sps:$4 sm:$0xff]  }
  0xfa   :  { %856 = vmatprep.subr.bf16.mxu1 %v1311_v58  ;;  %v1348_v58 = vld [vmem:[%s1804_s7 + $0xc0] ss:$28 sps:$4 sm:$0xff]  }
  0xfd   :  { %857 = vmatpush1.bf16.msra.mxu1 %v1309_v59  ;;  %v1351_v59 = vld [vmem:[%s1804_s7 + $0xf4] ss:$28 sps:$4 sm:$0xff]  }
  0xfe   :  { %858 = vmatprep.subr.bf16.mxu1 %v1317_v60  ;;  %v1349_v60 = vld [vmem:[%s1804_s7 + $0xf0] ss:$28 sps:$4 sm:$0xff]  }
 0x101   :  { %859 = vmatpush1.bf16.msra.mxu1 %v1315_v61  ;;  %v1352_v61 = vld [vmem:[%s1804_s7 + $0xf8] ss:$28 sps:$4 sm:$0xff]  }
 0x102   :  { %860 = vmatprep.subr.bf16.mxu1 %v1323_v30 }
 0x105   :  { %861 = vmatpush1.bf16.msra.mxu1 %v1321_v32 }
 0x106   :  { %862 = vmatprep.subr.bf16.mxu1 %v1329_v34  ;;  %v543_v34 = vsub.s32 4, %v1618_v63 }
 0x109   :  { %863 = vmatpush1.bf16.msra.mxu1 %v1327_v36  ;;  %v547_v36 = vsub.s32 5, %v1618_v63 }
 0x10a   :  { %930 = vmatprep.subr.bf16.mxu1 %v1335_v38 }
 0x1bf   :  { %v265_v6 = vpop.f32.mrb[0].mxu1 }
 0x1c0   :  { %v266_v7 = vadd.f32 %v265_v6, %v144_v4  ;;  %v267_v8 = vpop.f32.mrb[1].mxu1  ;;  %v1356_v4 = vld [vmem:[%s1804_s7 + $0x130] ss:$28 sps:$4 sm:$0xff]   ;;  %v1357_v6 = vld [vmem:[%s1804_s7 + $0x160] ss:$28 sps:$4 sm:$0xff]  }
 0x1c1   :  { %v268_v9 = vadd.f32 %v267_v8, %v148_v5  ;;  %v269_v10 = vpop.f32.mrb[2].mxu1  ;;  %v1359_v5 = vld [vmem:[%s1804_s7 + $0x164] ss:$28 sps:$4 sm:$0xff]   ;;  %v1363_v8 = vld [vmem:[%s1804_s7 + $0x19c] ss:$28 sps:$4 sm:$0xff]  }
 0x1c2   :  { %vm272_vm3 = vcmp.gt.f32.partialorder %v266_v7, 0.0  ;;  %v274_v11 = vmul.f32 0.1, %v266_v7  ;;  %v270_v12 = vpop.f32.mrb[3].mxu1  ;;  %v1364_v10 = vld [vmem:[%s1804_s7 + $0x1a0] ss:$28 sps:$4 sm:$0xff]  }
 0x1c3   :  { %vm273_vm4 = vcmp.gt.f32.partialorder %v268_v9, 0.0  ;;  %v275_v13 = vmul.f32 0.1, %v268_v9  ;;  %v523_v12 = vld [vmem:[%s1805_s8] sm:$0x7f] }
 0x1c4   :  { %v276_v14 = vsel %vm272_vm3, %v266_v7, %v274_v11  ;;  %v1360_v7 = vld [vmem:[%s1804_s7 + $0x168] ss:$28 sps:$4 sm:$0xff]   ;;  %v535_v11 = vsub.s32 2, %v1618_v63 }
 0x1c5   :  { %v277_v15 = vsel %vm273_vm4, %v268_v9, %v275_v13  ;;  %v278_v18 = vpack.c.bf16 %v276_v14, %v276_v14  ;;  %v1361_v9 = vld [vmem:[%s1804_s7 + $0x198] ss:$28 sps:$4 sm:$0xff]   ;;  %v539_v13 = vsub.s32 3, %v1618_v63  ;;  %v528_v14 = vrot.slane %v523_v12, %v143_v0 }
 0x1c6   :  { %v279_v16 = vpack.c.bf16 %v277_v15, %v277_v15  ;;  %v536_v15 = vrot.slane %v523_v12, %v535_v11 }
 0x1c8   :  { %447 = vmatprep.mubr.bf16.mxu0 %v279_v16  ;;  %v532_v16 = vrot.slane %v523_v12, %v147_v3 }
 0x1c9   :  { %448 = vmatmul.mubr.bf16.vlgmr.msra.gmra.mrb[4].mxu0 %v278_v18 }
 0x1ca   :  { %890 = vmatpush1.bf16.msra.mxu0 %v1288_v17  ;;  %921 = vmatprep.mubr.bf16.mxu0 %v1405_v23 }
 0x1cb   :  { %891 = vmatprep.subr.bf16.mxu0 %v1296_v19 }
 0x1ce   :  { %892 = vmatpush1.bf16.msra.mxu0 %v1294_v20 }
 0x1cf   :  { %893 = vmatprep.subr.bf16.mxu0 %v1302_v21 }
 0x1d2   :  { %894 = vmatpush1.bf16.msra.mxu0 %v1300_v22 }
 0x1d3   :  { %895 = vmatprep.subr.bf16.mxu0 %v1308_v24 }
 0x1d6   :  { %896 = vmatpush1.bf16.msra.mxu0 %v1306_v25 }
 0x1d7   :  { %897 = vmatprep.subr.bf16.mxu0 %v1314_v26 }
 0x1da   :  { %898 = vmatpush1.bf16.msra.mxu0 %v1312_v27 }
 0x1db   :  { %899 = vmatprep.subr.bf16.mxu0 %v1320_v28 }
 0x1de   :  { %900 = vmatpush1.bf16.msra.mxu0 %v1318_v29 }
 0x1df   :  { %901 = vmatprep.subr.bf16.mxu0 %v1326_v31 }
 0x1e2   :  { %902 = vmatpush1.bf16.msra.mxu0 %v1324_v33 }
 0x1e3   :  { %903 = vmatprep.subr.bf16.mxu0 %v1332_v35  ;;  %v551_v35 = vsub.s32 6, %v1618_v63 }
 0x1e5   :  { %v552_v38 = vrot.slane %v523_v12, %v551_v35 }
 0x1e6   :  { %904 = vmatpush1.bf16.msra.mxu0 %v1330_v37  ;;  %v544_v37 = vrot.slane %v523_v12, %v543_v34 }
 0x1e7   :  { %1217 = vmatprep.subr.bf16.mxu0 %v1403_v1 }
 0x29c   :  { %v1190_v39 = vpop.f32.mrb[4].mxu0 }
 0x29d   :  { %v1191_v41 = vpop.f32.mrb[5].mxu0 }
 0x29e   :  { %v1192_v42 = vadd.f32 %v1191_v41, %v1190_v39  ;;  %v1193_v43 = vpop.f32.mrb[6].mxu0  ;;  %v548_v39 = vrot.slane %v523_v12, %v547_v36 }
 0x29f   :  { %v1194_v44 = vpop.f32.mrb[7].mxu0 }
 0x2a0   :  { %v450_v45 = vadd.f32 %v1192_v42, %v1088_v40 }
 0x2a2   :  { %vm455_vm5 = vcmp.gt.f32.partialorder %v450_v45, 0.0  ;;  %v456_v46 = vmul.f32 0.1, %v450_v45 }
 0x2a4   :  { %v457_v47 = vsel %vm455_vm5, %v450_v45, %v456_v46 }
 0x2a5   :  { %v458_v50 = vpack.c.bf16 %v457_v47, %v457_v47 }
 0x2a7   :  { %881 = vmatmul.mubr.bf16.vlgmr.msra.gmra.mrb[4].mxu1 %v458_v50  ;;  %922 = vmatmul.mubr.bf16.vlgmr.msra.gmra.mrb[8].mxu0 %v458_v50 }
 0x2a8   :  { %931 = vmatpush1.bf16.msra.mxu1 %v1333_v48  ;;  %1218 = vmatpush3.bf16.msra.mxu0 %v1336_v49 }
 0x2a9   :  { %932 = vmatprep.subr.bf16.mxu1 %v1339_v51  ;;  %1219 = vmatprep.subr.bf16.mxu0 %v1403_v1 }
 0x2aa   :  { %962 = vmatprep.mubr.bf16.mxu1 %v1405_v23  ;;  %1233 = vmatprep.mubr.msk.bf16.mxu0 %vm1404_vm0, %v1403_v1  ;;  %v1347_v23 = vld [vmem:[%s1804_s7 + $0xbc] ss:$28 sps:$4 sm:$0xff]   ;;  %s1406_s7 = smov [#allocation2]  }
 0x2ab   :  { %s1058_s8 = sshll.u32 %s1406_s7, 4  ;;  %s1059_s8 = int_to_ptr.vmem [resolvable:$true] %s1058_s8 }
 0x2ac   :  { %933 = vmatpush1.bf16.msra.mxu1 %v1337_v52  ;;  %1220 = vmatpush3.bf16.msra.mxu0 %v1340_v53  ;;  %s1379_s5 = scalar_lea.vmem %s1059_s8, 448  ;;  %p1384_p1 = scmp.lt.s32.totalorder %s1059_s8, %s1059_s8 }
 0x2ad   :  { %934 = vmatprep.subr.bf16.mxu1 %v1343_v54  ;;  %1221 = vmatprep.subr.bf16.mxu0 %v1403_v1  ;;  %p1380_p0 = scmp.ne.s32.totalorder %s1059_s8, %s1379_s5  ;;  %p1385_p2 = scmp.lt.s32.totalorder %s1379_s5, %s1379_s5 }
 0x2af   :  { %p1386_p3 = por %p1385_p2, %p1384_p1 }
 0x2b0   :  { %935 = vmatpush1.bf16.msra.mxu1 %v1341_v55  ;;  %1222 = vmatpush3.bf16.msra.mxu0 %v1344_v56 }
 0x2b1   :  { %936 = vmatprep.subr.bf16.mxu1 %v1347_v23  ;;  %1223 = vmatprep.subr.bf16.mxu0 %v1403_v1  ;;  %p1387_p4 = pnand %p1386_p3, %p1380_p0 }
 0x2b4   :  { %937 = vmatpush1.bf16.msra.mxu1 %v1345_v57  ;;  %1224 = vmatpush3.bf16.msra.mxu0 %v1348_v58 }
 0x2b5   :  { %938 = vmatprep.subr.bf16.mxu1 %v1351_v59  ;;  %1225 = vmatprep.subr.bf16.mxu0 %v1403_v1 }
 0x2b8   :  { %939 = vmatpush1.bf16.msra.mxu1 %v1349_v60  ;;  %1226 = vmatpush3.bf16.msra.mxu0 %v1352_v61 }
 0x2b9   :  { %940 = vmatprep.subr.bf16.mxu1 %v1355_v62  ;;  %1227 = vmatprep.subr.bf16.mxu0 %v1403_v1 }
 0x2bc   :  { %941 = vmatpush1.bf16.msra.mxu1 %v1353_v2  ;;  %1228 = vmatpush3.bf16.msra.mxu0 %v1356_v4 }
 0x2bd   :  { %942 = vmatprep.subr.bf16.mxu1 %v1359_v5  ;;  %1229 = vmatprep.subr.bf16.mxu0 %v1403_v1 }
 0x2c0   :  { %943 = vmatpush1.bf16.msra.mxu1 %v1357_v6  ;;  %1230 = vmatpush3.bf16.msra.mxu0 %v1360_v7 }
 0x2c1   :  { %944 = vmatprep.subr.bf16.mxu1 %v1363_v8  ;;  %1231 = vmatprep.subr.bf16.mxu0 %v1403_v1  ;;  %v540_v1 = vrot.slane %v523_v12, %v539_v13 }
 0x2c4   :  { %945 = vmatpush1.bf16.msra.mxu1 %v1361_v9  ;;  %1232 = vmatpush3.bf16.msra.mxu0 %v1364_v10 }
 0x2c7   :  { %963 = vmatmul.mubr.bf16.vlgmr.msra.gmra.mrb[8].mxu1 %v458_v50  ;;  %1234 = vmatmul.mubr.bf16.vlgmr.msra.gmra.mrb[12].mxu0 %v458_v50 }
 0x37a   :  { %v882_v17 = vpop.f32.mrb[4].mxu1  ;;  %v923_v18 = vpop.f32.mrb[8].mxu0 }
 0x37b   :  { %v883_v19 = vadd.f32 %v882_v17, %v528_v14  ;;  %v924_v20 = vadd.f32 %v923_v18, %v536_v15  ;;  %v884_v21 = vpop.f32.mrb[5].mxu1  ;;  %v925_v22 = vpop.f32.mrb[9].mxu0 }
 0x37c   :  { %v885_v24 = vadd.f32 %v884_v21, %v532_v16  ;;  %v926_v25 = vadd.f32 %v925_v22, %v540_v1  ;;  %v886_v26 = vpop.f32.mrb[6].mxu1  ;;  %v927_v27 = vpop.f32.mrb[10].mxu0 }
 0x37d   :  { %1365 = vtanh.f32 %v883_v19  ;;  %v887_v28 = vpop.f32.mrb[7].mxu1  ;;  %v928_v29 = vpop.f32.mrb[11].mxu0 }
 0x37e   :  { %1367 = vtanh.f32 %v924_v20 }
 0x37f   :  { %1369 = vtanh.f32 %v885_v24 }
 0x380   :  { %1371 = vtanh.f32 %v926_v25 }
 0x387   :  { %v1366_v0 = vpop.eup %1365 }
 0x388   :  { %v1368_v30 = vpop.eup %1367 }
 0x389   :  { %v1370_v3 = vpop.eup %1369 }
 0x38a   :  { %v1372_v31 = vpop.eup %1371  ;;  %v1165_v32 = vpack.c.bf16 %v1370_v3, %v1366_v0 }
 0x38b   :  { %v1166_v33 = vpack.c.bf16 %v1372_v31, %v1368_v30 }
 0x38c   :  { %1047 = vst [vmem:[#allocation2] sm:$0xff] %v1165_v32 }
 0x38d   :  { %1048 = vst [vmem:[#allocation2 + $0x8] sm:$0xff] %v1166_v33 }
 0x39a   :  { %v964_v40 = vpop.f32.mrb[8].mxu1  ;;  %v1005_v41 = vpop.f32.mrb[12].mxu0 }
 0x39b   :  { %v965_v42 = vadd.f32 %v964_v40, %v544_v37  ;;  %v1006_v43 = vadd.f32 %v1005_v41, %v552_v38  ;;  %v966_v44 = vpop.f32.mrb[9].mxu1  ;;  %v1235_v45 = vpop.f32.mrb[13].mxu0 }
 0x39c   :  { %v967_v46 = vadd.f32 %v966_v44, %v548_v39  ;;  %v968_v47 = vpop.f32.mrb[10].mxu1  ;;  %v1008_v48 = vpop.f32.mrb[14].mxu0 }
 0x39d   :  { %1373 = vtanh.f32 %v965_v42  ;;  %v969_v49 = vpop.f32.mrb[11].mxu1  ;;  %v1236_v50 = vpop.f32.mrb[15].mxu0 }
 0x39e   :  { %1375 = vtanh.f32 %v1006_v43 }
 0x39f   :  { %1377 = vtanh.f32 %v967_v46 }
 0x3a7   :  { %v1374_v51 = vpop.eup %1373 }
 0x3a8   :  { %v1376_v63 = vpop.eup %1375 }
 0x3a9   :  { %v1378_v52 = vpop.eup %1377  ;;  %v1168_v53 = vpack.c.bf16 %v1376_v63, %v1376_v63 }
 0x3aa   :  { %v1167_v54 = vpack.c.bf16 %v1378_v52, %v1374_v51 }
 0x3ab   :  { %1051 = vst.msk [vmem:[#allocation2 + $0x18] sm:$0xf] %vm1050_vm6, %v1168_v53 }
 0x3ac   :  { %1049 = vst [vmem:[#allocation2 + $0x10] sm:$0xff] %v1167_v54 }
 0x3ad   :  { %1390 = shalt.err (!%p1387_p4)
}
 0x3ae   :  { %s1391_s23 = scalar_lea.hbm %s1806_s9, 448 }
 0x3af   :  { %p1392_p5 = scmp.ne.s32.totalorder %s1806_s9, %s1391_s23  ;;  %p1395_p6 = scmp.lt.u32.totalorder %s1391_s23, %s1806_s9 }
 0x3b1   :  { %p1397_p7 = pnand %p1395_p6, %p1392_p5 }
 0x3b3   :  { %1400 = shalt.err (!%p1397_p7)
}
 0x3b4   :  { %1061 = dma.vmem_to_hbm [thread:$0]  %s1059_s8, 448, %s1806_s9, [#allocation3]  }
 0x3b5   :  { %1401 = dma.done.wait [#allocation3], 448  }
 0x3b6   :  { %1402 = vsyncadd [#allocation3], 4294966848 }
 0x3b7   :  { %1065 = vsyncpa [#allocation3], 1 }

</bundles_post_ra>
